<compile_context>
chip_gen: v7x
topology: tpu7x:2x2x1
jax: 0.10.0
libtpu: 0.0.40
codegen_flags: <defaults>
</compile_context>

<pallas_src>
import jax
import jax.numpy as jnp
from jax.experimental import pallas as pl
from jax.experimental.pallas import tpu as pltpu


def _hard_swish(x):
    # F.relu6(x + 3) / 6 * x
    return jnp.clip(x + 3.0, 0.0, 6.0) * (1.0 / 6.0) * x


def _round_up(x, m):
    return ((x + m - 1) // m) * m


def actor_kernel(x0_ref,
                 w0_ref, b0_ref,
                 w1_ref, b1_ref,
                 w2a_ref, w2b_ref, b2_ref,
                 w3a_ref, w3b_ref, w3c_ref, b3_ref,
                 out_ref):
    x0 = x0_ref[...]

    # dense0 + hard_swish
    x1 = _hard_swish(
        jnp.dot(x0, w0_ref[...], preferred_element_type=jnp.float32)
        + b0_ref[...])

    # dense1 + hard_swish
    h1 = _hard_swish(
        jnp.dot(x1, w1_ref[...], preferred_element_type=jnp.float32)
        + b1_ref[...])

    # dense2 on concat([x1, h1]) expressed as split-weight accumulation
    # (avoids a lane-axis concatenate / XLU relayout).
    z2 = (jnp.dot(x1, w2a_ref[...], preferred_element_type=jnp.float32)
          + jnp.dot(h1, w2b_ref[...], preferred_element_type=jnp.float32)
          + b2_ref[...])
    h2 = _hard_swish(z2)

    # dropout: identity in eval mode.

    # dense3 on concat([x1, h1, h2]) expressed as split-weight accumulation.
    z3 = (jnp.dot(x1, w3a_ref[...], preferred_element_type=jnp.float32)
          + jnp.dot(h1, w3b_ref[...], preferred_element_type=jnp.float32)
          + jnp.dot(h2, w3c_ref[...], preferred_element_type=jnp.float32)
          + b3_ref[...])

    # Lane-dense [TILE_B, A_pad] store (padded columns carry tanh(0)=0,
    # cropped by the wrapper).
    out_ref[...] = jnp.tanh(z3).astype(out_ref.dtype)


def actor_forward(x0, params, tile_b=512):
    """x0: [B, state_dim] float32.  params: dict of weights/biases.

    Weights are stored [in_features, out_features]; biases are [1, out].
    """
    x0 = jnp.asarray(x0, jnp.float32)
    B, S = x0.shape
    M = params["w0"].shape[1]
    A = params["w3"].shape[1]

    # --- lane-dense output: pad action_dim to a multiple of 128 -------------
    A_pad = _round_up(max(A, 128), 128)
    w3p = jnp.zeros((4 * M, A_pad), jnp.float32).at[:, :A].set(params["w3"])
    b3p = jnp.zeros((1, A_pad), jnp.float32).at[:, :A].set(params["b3"])

    # --- split weights once in the wrapper (removes in-kernel concats) ------
    w2a = params["w2"][:M]          # applied to x1
    w2b = params["w2"][M:]          # applied to h1
    w3a = w3p[:M]                   # applied to x1
    w3b = w3p[M:2 * M]              # applied to h1
    w3c = w3p[2 * M:]               # applied to h2

    # --- batch tiling: large, sublane-aligned tiles; pad B up front ---------
    tile_b = min(tile_b, _round_up(B, 8))
    tile_b = _round_up(tile_b, 8)
    B_pad = _round_up(B, tile_b)
    if B_pad != B:
        x0 = jnp.pad(x0, ((0, B_pad - B), (0, 0)))
    grid = (B_pad // tile_b,)

    weights = (params["w0"], params["b0"],
               params["w1"], params["b1"],
               w2a, w2b, params["b2"],
               w3a, w3b, w3c, b3p)

    def _resident_spec(a):
        # Full-array block, constant index_map -> stays VMEM-resident across
        # grid steps.  Default-arg capture avoids the late-binding lambda bug.
        return pl.BlockSpec(a.shape, lambda i, _nd=a.ndim: (0,) * _nd)

    in_specs = ([pl.BlockSpec((tile_b, S), lambda i: (i, 0))]
                + [_resident_spec(a) for a in weights])
    out_specs = pl.BlockSpec((tile_b, A_pad), lambda i: (i, 0))

    out_padded = pl.pallas_call(
        actor_kernel,
        out_shape=jax.ShapeDtypeStruct((B_pad, A_pad), jnp.float32),
        grid=grid,
        in_specs=in_specs,
        out_specs=out_specs,
        compiler_params=pltpu.CompilerParams(
            dimension_semantics=("parallel",)),
    )(x0, *weights)

    return out_padded[:B, :A]


def init_actor_params(key, state_dim, action_dim, mod_dim):
    """Deterministic init mimicking nn.Linear's U(-1/sqrt(fan_in), +1/sqrt(fan_in))."""
    def linear(k, fan_in, fan_out):
        kw, kb = jax.random.split(k)
        bound = 1.0 / jnp.sqrt(fan_in)
        w = jax.random.uniform(kw, (fan_in, fan_out), jnp.float32, -bound, bound)
        b = jax.random.uniform(kb, (1, fan_out), jnp.float32, -bound, bound)
        return w, b

    k0, k1, k2, k3 = jax.random.split(key, 4)
    w0, b0 = linear(k0, state_dim, mod_dim * 1)
    w1, b1 = linear(k1, mod_dim * 1, mod_dim * 1)
    w2, b2 = linear(k2, mod_dim * 2, mod_dim * 2)
    w3, b3 = linear(k3, mod_dim * 4, action_dim)
    return dict(w0=w0, b0=b0, w1=w1, b1=b1, w2=w2, b2=b2, w3=w3, b3=b3)


def actor_ref(x0, p):
    """Pure-JAX reference for correctness checking (mirrors the PyTorch graph)."""
    x1 = _hard_swish(x0 @ p["w0"] + p["b0"])
    x2 = jnp.concatenate([x1, _hard_swish(x1 @ p["w1"] + p["b1"])], axis=1)
    x3 = jnp.concatenate([x2, _hard_swish(x2 @ p["w2"] + p["b2"])], axis=1)
    return jnp.tanh(x3 @ p["w3"] + p["b3"])


if __name__ == "__main__":
    B, STATE_DIM, ACTION_DIM, MOD_DIM = 8, 16, 4, 32

    key = jax.random.PRNGKey(0)
    kx, kp, kx2 = jax.random.split(key, 3)
    x0 = jax.random.normal(kx, (B, STATE_DIM), jnp.float32)
    params = init_actor_params(kp, STATE_DIM, ACTION_DIM, MOD_DIM)

    # Small batch (single grid step).
    out = jax.block_until_ready(actor_forward(x0, params))
    ref = actor_ref(x0, params)
    assert out.shape == (B, ACTION_DIM), out.shape
    assert jnp.allclose(out, ref, atol=1e-4, rtol=1e-4), float(
        jnp.max(jnp.abs(out - ref)))

    # Larger, non-divisible batch: exercises the grid, padding and cropping.
    B2 = 300
    x0b = jax.random.normal(kx2, (B2, STATE_DIM), jnp.float32)
    out2 = jax.block_until_ready(actor_forward(x0b, params, tile_b=128))
    ref2 = actor_ref(x0b, params)
    assert out2.shape == (B2, ACTION_DIM), out2.shape
    assert jnp.allclose(out2, ref2, atol=1e-4, rtol=1e-4), float(
        jnp.max(jnp.abs(out2 - ref2)))

    print("KERNEL_OK")
</pallas_src>

<mosaic_0001>
module attributes {stable_mosaic.version = 11 : i64} {
  func.func @actor_kernel(%arg0: i32, %arg1: memref<8x16xf32, #tpu.memory_space<vmem>>, %arg2: memref<16x32xf32, #tpu.memory_space<vmem>>, %arg3: memref<1x32xf32, #tpu.memory_space<vmem>>, %arg4: memref<32x32xf32, #tpu.memory_space<vmem>>, %arg5: memref<1x32xf32, #tpu.memory_space<vmem>>, %arg6: memref<32x64xf32, #tpu.memory_space<vmem>>, %arg7: memref<32x64xf32, #tpu.memory_space<vmem>>, %arg8: memref<1x64xf32, #tpu.memory_space<vmem>>, %arg9: memref<32x128xf32, #tpu.memory_space<vmem>>, %arg10: memref<32x128xf32, #tpu.memory_space<vmem>>, %arg11: memref<64x128xf32, #tpu.memory_space<vmem>>, %arg12: memref<1x128xf32, #tpu.memory_space<vmem>>, %arg13: memref<8x128xf32, #tpu.memory_space<vmem>>) attributes {dimension_semantics = [#tpu.dimension_semantics<parallel>], iteration_bounds = array<i64: 1>, scalar_prefetch = 0 : i64, scratch_operands = 0 : i64, tpu.core_type = #tpu.core_type<tc>, window_params = [{transform_indices = @transform_0, window_bounds = array<i64: 8, 16>}, {pipeline_mode = #tpu.pipeline_mode<synchronous>, transform_indices = @transform_1, window_bounds = array<i64: 16, 32>}, {pipeline_mode = #tpu.pipeline_mode<synchronous>, transform_indices = @transform_2, window_bounds = array<i64: 1, 32>}, {pipeline_mode = #tpu.pipeline_mode<synchronous>, transform_indices = @transform_3, window_bounds = array<i64: 32, 32>}, {pipeline_mode = #tpu.pipeline_mode<synchronous>, transform_indices = @transform_4, window_bounds = array<i64: 1, 32>}, {pipeline_mode = #tpu.pipeline_mode<synchronous>, transform_indices = @transform_5, window_bounds = array<i64: 32, 64>}, {pipeline_mode = #tpu.pipeline_mode<synchronous>, transform_indices = @transform_6, window_bounds = array<i64: 32, 64>}, {pipeline_mode = #tpu.pipeline_mode<synchronous>, transform_indices = @transform_7, window_bounds = array<i64: 1, 64>}, {pipeline_mode = #tpu.pipeline_mode<synchronous>, transform_indices = @transform_8, window_bounds = array<i64: 32, 128>}, {pipeline_mode = #tpu.pipeline_mode<synchronous>, transform_indices = @transform_9, window_bounds = array<i64: 32, 128>}, {pipeline_mode = #tpu.pipeline_mode<synchronous>, transform_indices = @transform_10, window_bounds = array<i64: 64, 128>}, {pipeline_mode = #tpu.pipeline_mode<synchronous>, transform_indices = @transform_11, window_bounds = array<i64: 1, 128>}, {transform_indices = @transform_12, window_bounds = array<i64: 8, 128>}]} {
    %c0 = arith.constant 0 : index
    %c0_0 = arith.constant 0 : index
    %0 = vector.load %arg1[%c0, %c0_0] : memref<8x16xf32, #tpu.memory_space<vmem>>, vector<8x16xf32>
    %c0_1 = arith.constant 0 : index
    %c0_2 = arith.constant 0 : index
    %1 = vector.load %arg2[%c0_1, %c0_2] : memref<16x32xf32, #tpu.memory_space<vmem>>, vector<16x32xf32>
    %cst = arith.constant dense<0.000000e+00> : vector<8x32xf32>
    %2 = tpu.matmul %0, %1, %cst {dimension_numbers = #tpu.dot_dimension_numbers<[1], [0], [0], [1], [0, 0, 1, 1], [], []>} : vector<8x16xf32>, vector<16x32xf32>, vector<8x32xf32> -> vector<8x32xf32>
    %c0_3 = arith.constant 0 : index
    %c0_4 = arith.constant 0 : index
    %3 = vector.load %arg3[%c0_3, %c0_4] : memref<1x32xf32, #tpu.memory_space<vmem>>, vector<1x32xf32>
    %4 = vector.broadcast %3 : vector<1x32xf32> to vector<8x32xf32>
    %5 = arith.addf %2, %4 : vector<8x32xf32>
    %cst_5 = arith.constant 3.000000e+00 : f32
    %6 = vector.broadcast %cst_5 : f32 to vector<8x32xf32>
    %7 = arith.addf %5, %6 : vector<8x32xf32>
    %cst_6 = arith.constant 0.000000e+00 : f32
    %cst_7 = arith.constant 6.000000e+00 : f32
    %8 = vector.broadcast %cst_6 : f32 to vector<8x32xf32>
    %9 = arith.maximumf %8, %7 : vector<8x32xf32>
    %10 = vector.broadcast %cst_7 : f32 to vector<8x32xf32>
    %11 = arith.minimumf %10, %9 : vector<8x32xf32>
    %cst_8 = arith.constant 0.166666672 : f32
    %12 = vector.broadcast %cst_8 : f32 to vector<8x32xf32>
    %13 = arith.mulf %11, %12 : vector<8x32xf32>
    %14 = arith.mulf %13, %5 : vector<8x32xf32>
    %c0_9 = arith.constant 0 : index
    %c0_10 = arith.constant 0 : index
    %15 = vector.load %arg4[%c0_9, %c0_10] : memref<32x32xf32, #tpu.memory_space<vmem>>, vector<32x32xf32>
    %cst_11 = arith.constant dense<0.000000e+00> : vector<8x32xf32>
    %16 = tpu.matmul %14, %15, %cst_11 {dimension_numbers = #tpu.dot_dimension_numbers<[1], [0], [0], [1], [0, 0, 1, 1], [], []>} : vector<8x32xf32>, vector<32x32xf32>, vector<8x32xf32> -> vector<8x32xf32>
    %c0_12 = arith.constant 0 : index
    %c0_13 = arith.constant 0 : index
    %17 = vector.load %arg5[%c0_12, %c0_13] : memref<1x32xf32, #tpu.memory_space<vmem>>, vector<1x32xf32>
    %18 = vector.broadcast %17 : vector<1x32xf32> to vector<8x32xf32>
    %19 = arith.addf %16, %18 : vector<8x32xf32>
    %cst_14 = arith.constant 3.000000e+00 : f32
    %20 = vector.broadcast %cst_14 : f32 to vector<8x32xf32>
    %21 = arith.addf %19, %20 : vector<8x32xf32>
    %cst_15 = arith.constant 0.000000e+00 : f32
    %cst_16 = arith.constant 6.000000e+00 : f32
    %22 = vector.broadcast %cst_15 : f32 to vector<8x32xf32>
    %23 = arith.maximumf %22, %21 : vector<8x32xf32>
    %24 = vector.broadcast %cst_16 : f32 to vector<8x32xf32>
    %25 = arith.minimumf %24, %23 : vector<8x32xf32>
    %cst_17 = arith.constant 0.166666672 : f32
    %26 = vector.broadcast %cst_17 : f32 to vector<8x32xf32>
    %27 = arith.mulf %25, %26 : vector<8x32xf32>
    %28 = arith.mulf %27, %19 : vector<8x32xf32>
    %c0_18 = arith.constant 0 : index
    %c0_19 = arith.constant 0 : index
    %29 = vector.load %arg6[%c0_18, %c0_19] : memref<32x64xf32, #tpu.memory_space<vmem>>, vector<32x64xf32>
    %cst_20 = arith.constant dense<0.000000e+00> : vector<8x64xf32>
    %30 = tpu.matmul %14, %29, %cst_20 {dimension_numbers = #tpu.dot_dimension_numbers<[1], [0], [0], [1], [0, 0, 1, 1], [], []>} : vector<8x32xf32>, vector<32x64xf32>, vector<8x64xf32> -> vector<8x64xf32>
    %c0_21 = arith.constant 0 : index
    %c0_22 = arith.constant 0 : index
    %31 = vector.load %arg7[%c0_21, %c0_22] : memref<32x64xf32, #tpu.memory_space<vmem>>, vector<32x64xf32>
    %cst_23 = arith.constant dense<0.000000e+00> : vector<8x64xf32>
    %32 = tpu.matmul %28, %31, %cst_23 {dimension_numbers = #tpu.dot_dimension_numbers<[1], [0], [0], [1], [0, 0, 1, 1], [], []>} : vector<8x32xf32>, vector<32x64xf32>, vector<8x64xf32> -> vector<8x64xf32>
    %33 = arith.addf %30, %32 : vector<8x64xf32>
    %c0_24 = arith.constant 0 : index
    %c0_25 = arith.constant 0 : index
    %34 = vector.load %arg8[%c0_24, %c0_25] : memref<1x64xf32, #tpu.memory_space<vmem>>, vector<1x64xf32>
    %35 = vector.broadcast %34 : vector<1x64xf32> to vector<8x64xf32>
    %36 = arith.addf %33, %35 : vector<8x64xf32>
    %cst_26 = arith.constant 3.000000e+00 : f32
    %37 = vector.broadcast %cst_26 : f32 to vector<8x64xf32>
    %38 = arith.addf %36, %37 : vector<8x64xf32>
    %cst_27 = arith.constant 0.000000e+00 : f32
    %cst_28 = arith.constant 6.000000e+00 : f32
    %39 = vector.broadcast %cst_27 : f32 to vector<8x64xf32>
    %40 = arith.maximumf %39, %38 : vector<8x64xf32>
    %41 = vector.broadcast %cst_28 : f32 to vector<8x64xf32>
    %42 = arith.minimumf %41, %40 : vector<8x64xf32>
    %cst_29 = arith.constant 0.166666672 : f32
    %43 = vector.broadcast %cst_29 : f32 to vector<8x64xf32>
    %44 = arith.mulf %42, %43 : vector<8x64xf32>
    %45 = arith.mulf %44, %36 : vector<8x64xf32>
    %c0_30 = arith.constant 0 : index
    %c0_31 = arith.constant 0 : index
    %46 = vector.load %arg9[%c0_30, %c0_31] : memref<32x128xf32, #tpu.memory_space<vmem>>, vector<32x128xf32>
    %cst_32 = arith.constant dense<0.000000e+00> : vector<8x128xf32>
    %47 = tpu.matmul %14, %46, %cst_32 {dimension_numbers = #tpu.dot_dimension_numbers<[1], [0], [0], [1], [0, 0, 1, 1], [], []>} : vector<8x32xf32>, vector<32x128xf32>, vector<8x128xf32> -> vector<8x128xf32>
    %c0_33 = arith.constant 0 : index
    %c0_34 = arith.constant 0 : index
    %48 = vector.load %arg10[%c0_33, %c0_34] : memref<32x128xf32, #tpu.memory_space<vmem>>, vector<32x128xf32>
    %cst_35 = arith.constant dense<0.000000e+00> : vector<8x128xf32>
    %49 = tpu.matmul %28, %48, %cst_35 {dimension_numbers = #tpu.dot_dimension_numbers<[1], [0], [0], [1], [0, 0, 1, 1], [], []>} : vector<8x32xf32>, vector<32x128xf32>, vector<8x128xf32> -> vector<8x128xf32>
    %50 = arith.addf %47, %49 : vector<8x128xf32>
    %c0_36 = arith.constant 0 : index
    %c0_37 = arith.constant 0 : index
    %51 = vector.load %arg11[%c0_36, %c0_37] : memref<64x128xf32, #tpu.memory_space<vmem>>, vector<64x128xf32>
    %cst_38 = arith.constant dense<0.000000e+00> : vector<8x128xf32>
    %52 = tpu.matmul %45, %51, %cst_38 {dimension_numbers = #tpu.dot_dimension_numbers<[1], [0], [0], [1], [0, 0, 1, 1], [], []>} : vector<8x64xf32>, vector<64x128xf32>, vector<8x128xf32> -> vector<8x128xf32>
    %53 = arith.addf %50, %52 : vector<8x128xf32>
    %c0_39 = arith.constant 0 : index
    %c0_40 = arith.constant 0 : index
    %54 = vector.load %arg12[%c0_39, %c0_40] : memref<1x128xf32, #tpu.memory_space<vmem>>, vector<1x128xf32>
    %55 = vector.broadcast %54 : vector<1x128xf32> to vector<8x128xf32>
    %56 = arith.addf %53, %55 : vector<8x128xf32>
    %57 = math.tanh %56 : vector<8x128xf32>
    %c0_41 = arith.constant 0 : index
    %c0_42 = arith.constant 0 : index
    %58 = vector.load %arg13[%c0_41, %c0_42] : memref<8x128xf32, #tpu.memory_space<vmem>>, vector<8x128xf32>
    tpu.vector_store %arg13[%c0_41, %c0_42], %57 {strides = array<i32>} : memref<8x128xf32, #tpu.memory_space<vmem>>, vector<8x128xf32>,
    return
  }
  func.func @transform_0(%arg0: i32) -> (i32, i32) {
    %c0_i32 = arith.constant 0 : i32
    %c0_i32_0 = arith.constant 0 : i32
    return %arg0, %c0_i32 : i32, i32
  }
  func.func @transform_1(%arg0: i32) -> (i32, i32) {
    %c0_i32 = arith.constant 0 : i32
    %c0_i32_0 = arith.constant 0 : i32
    %c0_i32_1 = arith.constant 0 : i32
    return %c0_i32, %c0_i32_0 : i32, i32
  }
  func.func @transform_2(%arg0: i32) -> (i32, i32) {
    %c0_i32 = arith.constant 0 : i32
    %c0_i32_0 = arith.constant 0 : i32
    %c0_i32_1 = arith.constant 0 : i32
    return %c0_i32, %c0_i32_0 : i32, i32
  }
  func.func @transform_3(%arg0: i32) -> (i32, i32) {
    %c0_i32 = arith.constant 0 : i32
    %c0_i32_0 = arith.constant 0 : i32
    %c0_i32_1 = arith.constant 0 : i32
    return %c0_i32, %c0_i32_0 : i32, i32
  }
  func.func @transform_4(%arg0: i32) -> (i32, i32) {
    %c0_i32 = arith.constant 0 : i32
    %c0_i32_0 = arith.constant 0 : i32
    %c0_i32_1 = arith.constant 0 : i32
    return %c0_i32, %c0_i32_0 : i32, i32
  }
  func.func @transform_5(%arg0: i32) -> (i32, i32) {
    %c0_i32 = arith.constant 0 : i32
    %c0_i32_0 = arith.constant 0 : i32
    %c0_i32_1 = arith.constant 0 : i32
    return %c0_i32, %c0_i32_0 : i32, i32
  }
  func.func @transform_6(%arg0: i32) -> (i32, i32) {
    %c0_i32 = arith.constant 0 : i32
    %c0_i32_0 = arith.constant 0 : i32
    %c0_i32_1 = arith.constant 0 : i32
    return %c0_i32, %c0_i32_0 : i32, i32
  }
  func.func @transform_7(%arg0: i32) -> (i32, i32) {
    %c0_i32 = arith.constant 0 : i32
    %c0_i32_0 = arith.constant 0 : i32
    %c0_i32_1 = arith.constant 0 : i32
    return %c0_i32, %c0_i32_0 : i32, i32
  }
  func.func @transform_8(%arg0: i32) -> (i32, i32) {
    %c0_i32 = arith.constant 0 : i32
    %c0_i32_0 = arith.constant 0 : i32
    %c0_i32_1 = arith.constant 0 : i32
    return %c0_i32, %c0_i32_0 : i32, i32
  }
  func.func @transform_9(%arg0: i32) -> (i32, i32) {
    %c0_i32 = arith.constant 0 : i32
    %c0_i32_0 = arith.constant 0 : i32
    %c0_i32_1 = arith.constant 0 : i32
    return %c0_i32, %c0_i32_0 : i32, i32
  }
  func.func @transform_10(%arg0: i32) -> (i32, i32) {
    %c0_i32 = arith.constant 0 : i32
    %c0_i32_0 = arith.constant 0 : i32
    %c0_i32_1 = arith.constant 0 : i32
    return %c0_i32, %c0_i32_0 : i32, i32
  }
  func.func @transform_11(%arg0: i32) -> (i32, i32) {
    %c0_i32 = arith.constant 0 : i32
    %c0_i32_0 = arith.constant 0 : i32
    %c0_i32_1 = arith.constant 0 : i32
    return %c0_i32, %c0_i32_0 : i32, i32
  }
  func.func @transform_12(%arg0: i32) -> (i32, i32) {
    %c0_i32 = arith.constant 0 : i32
    %c0_i32_0 = arith.constant 0 : i32
    return %arg0, %c0_i32 : i32, i32
  }
}

</mosaic_0001>

<bundles_post_ra>
// kernel: tpu_custom_call.1
= control target key start
LH: loop header
LB: loop body
LE: loop exit
PB: predicated region body
PF: predicated region fallthrough
CT: control target
= control target key end

     0   :  { %17 = vsyncpa [#allocation3], 0  ;;  %s1410_s0 = inlined_call_operand.hbm [shape: f32[8,16], index: 0, kind: input, shape index: {}]   ;;  %s1411_s1 = inlined_call_operand.hbm [shape: f32[16,32], index: 1, kind: input, shape index: {}]   ;;  %s1412_s2 = inlined_call_operand.vmem [shape: f32[1,32], index: 2, kind: input, shape index: {}]   ;;  %s1413_s3 = inlined_call_operand.hbm [shape: f32[32,32], index: 3, kind: input, shape index: {}]   ;;  %s1414_s4 = inlined_call_operand.vmem [shape: f32[1,32], index: 4, kind: input, shape index: {}]   ;;  %s1415_s5 = inlined_call_operand.hbm [shape: f32[32,64], index: 5, kind: input, shape index: {}]   ;;  %s1416_s6 = inlined_call_operand.hbm [shape: f32[32,64], index: 6, kind: input, shape index: {}]   ;;  %s1417_s7 = inlined_call_operand.hbm [shape: f32[1,64], index: 7, kind: input, shape index: {}]   ;;  %s1418_s8 = inlined_call_operand.hbm [shape: f32[32,128], index: 8, kind: input, shape index: {}]   ;;  %s1419_s9 = inlined_call_operand.vmem [shape: f32[32,128], index: 9, kind: input, shape index: {}]   ;;  %s1420_s10 = inlined_call_operand.hbm [shape: f32[64,128], index: 10, kind: input, shape index: {}]   ;;  %s1421_s11 = inlined_call_operand.vmem [shape: f32[1,128], index: 11, kind: input, shape index: {}]   ;;  %s1422_s12 = inlined_call_operand.hbm [shape: f32[8,128], index: 12, kind: output, shape index: {}]  }
   0x1   :  { %18 = vsyncpa [#allocation6], 0 }
   0x2   :  { %19 = vsyncpa [#allocation9], 0 }
   0x3   :  { %20 = vsyncpa [#allocation12], 0 }
   0x4   :  { %21 = vsyncpa [#allocation15], 0 }
   0x5   :  { %22 = vsyncpa [#allocation4], 0  ;;  %s1150_s21 = smov [#allocation5]   ;;  %s940_s25 = scalar_lea.hbm %s1411_s1, 256 }
   0x6   :  { %s38_s22 = sshll.u32 %s1150_s21, 4  ;;  %p941_p0 = scmp.ne.s32.totalorder %s1411_s1, %s940_s25  ;;  %s39_s22 = int_to_ptr.vmem [resolvable:$true] %s38_s22 }
   0x7   :  { %p944_p1 = scmp.lt.u32.totalorder %s940_s25, %s1411_s1 }
   0x9   :  { %p946_p2 = pnand %p944_p1, %p941_p0 }
   0xb   :  { %949 = shalt.err (!%p946_p2)
}
   0xc   :  { %s950_s30 = scalar_lea.vmem %s39_s22, 256  ;;  %p955_p4 = scmp.lt.s32.totalorder %s39_s22, %s39_s22 }
   0xd   :  { %p951_p3 = scmp.ne.s32.totalorder %s39_s22, %s950_s30  ;;  %p956_p5 = scmp.lt.s32.totalorder %s950_s30, %s950_s30 }
   0xf   :  { %p957_p6 = por %p956_p5, %p955_p4 }
  0x11   :  { %p958_p7 = pnand %p957_p6, %p951_p3 }
  0x13   :  { %961 = shalt.err (!%p958_p7)
}
  0x14   :  { %s1151_s13 = smov 128   ;;  %s1152_s14 = smov 8  }
  0x15   :  { %44 = dma.hbm_to_vmem [thread:$0]  %s1411_s1, 256, %s39_s22, [#allocation6], %s1151_s13, %s1151_s13, %s1152_s14  }
  0x16   :  { %s1153_s17 = smov [#allocation8]   ;;  %s1154_s19 = smov [#allocation11]  }
  0x17   :  { %s66_s18 = sshll.u32 %s1153_s17, 4  ;;  %s91_s20 = sshll.u32 %s1154_s19, 4  ;;  %s67_s18 = int_to_ptr.vmem [resolvable:$true] %s66_s18  ;;  %s92_s20 = int_to_ptr.vmem [resolvable:$true] %s91_s20 }
  0x18   :  { %s962_s24 = scalar_lea.hbm %s1415_s5, 512 }
  0x19   :  { %p963_p8 = scmp.ne.s32.totalorder %s1415_s5, %s962_s24  ;;  %p966_p9 = scmp.lt.u32.totalorder %s962_s24, %s1415_s5 }
  0x1b   :  { %p968_p10 = pnand %p966_p9, %p963_p8 }
  0x1d   :  { %971 = shalt.err (!%p968_p10)
}
  0x1e   :  { %s972_s1 = scalar_lea.vmem %s67_s18, 512  ;;  %p977_p12 = scmp.lt.s32.totalorder %s67_s18, %s67_s18 }
  0x1f   :  { %p973_p11 = scmp.ne.s32.totalorder %s67_s18, %s972_s1  ;;  %p978_p13 = scmp.lt.s32.totalorder %s972_s1, %s972_s1 }
  0x21   :  { %p979_p0 = por %p978_p13, %p977_p12 }
  0x23   :  { %p980_p1 = pnand %p979_p0, %p973_p11 }
  0x25   :  { %983 = shalt.err (!%p980_p1)
}
  0x26   :  { %72 = dma.hbm_to_vmem [thread:$0]  %s1415_s5, 512, %s67_s18, [#allocation9], %s1151_s13, %s1151_s13, %s1152_s14  }
  0x27   :  { %s984_s16 = scalar_lea.hbm %s1417_s7, 16 }
  0x28   :  { %p985_p2 = scmp.ne.s32.totalorder %s1417_s7, %s984_s16  ;;  %p988_p3 = scmp.lt.u32.totalorder %s984_s16, %s1417_s7 }
  0x2a   :  { %p990_p4 = pnand %p988_p3, %p985_p2 }
  0x2c   :  { %993 = shalt.err (!%p990_p4)
}
  0x2d   :  { %s994_s24 = scalar_lea.vmem %s92_s20, 16  ;;  %s998_s25 = scalar_lea.vmem %s92_s20, 32 }
  0x2e   :  { %p995_p5 = scmp.ne.s32.totalorder %s92_s20, %s994_s24  ;;  %p999_p6 = scmp.lt.s32.totalorder %s92_s20, %s92_s20 }
  0x2f   :  { %p1000_p7 = scmp.lt.s32.totalorder %s998_s25, %s994_s24 }
  0x31   :  { %p1001_p8 = por %p1000_p7, %p999_p6 }
  0x33   :  { %p1002_p9 = pnand %p1001_p8, %p995_p5 }
  0x35   :  { %1005 = shalt.err (!%p1002_p9)
}
  0x36   :  { %94 = dma.hbm_to_vmem [thread:$0]  %s1417_s7, 16, %s92_s20, [#allocation12]  }
  0x37   :  { %s1155_s26 = smov [#allocation2]   ;;  %s1156_s28 = smov [#allocation7]  }
  0x38   :  { %s29_s27 = sshll.u32 %s1155_s26, 4  ;;  %s52_s1 = sshll.u32 %s1156_s28, 4  ;;  %s30_s27 = int_to_ptr.vmem [resolvable:$true] %s29_s27  ;;  %s53_s1 = int_to_ptr.vmem [resolvable:$true] %s52_s1 }
  0x39   :  { %s1006_s30 = scalar_lea.hbm %s1410_s0, 128 }
  0x3a   :  { %p1007_p10 = scmp.ne.s32.totalorder %s1410_s0, %s1006_s30  ;;  %p1010_p11 = scmp.lt.u32.totalorder %s1006_s30, %s1410_s0 }
  0x3c   :  { %p1012_p12 = pnand %p1010_p11, %p1007_p10 }
  0x3e   :  { %1015 = shalt.err (!%p1012_p12)
}
  0x3f   :  { %s1016_s7 = scalar_lea.vmem %s30_s27, 128  ;;  %p1021_p0 = scmp.lt.s32.totalorder %s30_s27, %s30_s27 }
  0x40   :  { %p1017_p13 = scmp.ne.s32.totalorder %s30_s27, %s1016_s7  ;;  %p1022_p1 = scmp.lt.s32.totalorder %s1016_s7, %s1016_s7 }
  0x42   :  { %p1023_p2 = por %p1022_p1, %p1021_p0 }
  0x44   :  { %p1024_p3 = pnand %p1023_p2, %p1017_p13 }
  0x46   :  { %1027 = shalt.err (!%p1024_p3)
}
  0x47   :  { %32 = dma.hbm_to_vmem [thread:$0]  %s1410_s0, 128, %s30_s27, [#allocation3]  }
  0x48   :  { %s1028_s25 = scalar_lea.hbm %s1413_s3, 512 }
  0x49   :  { %p1029_p4 = scmp.ne.s32.totalorder %s1413_s3, %s1028_s25  ;;  %p1032_p5 = scmp.lt.u32.totalorder %s1028_s25, %s1413_s3 }
  0x4b   :  { %p1034_p6 = pnand %p1032_p5, %p1029_p4 }
  0x4d   :  { %1037 = shalt.err (!%p1034_p6)
}
  0x4e   :  { %s1038_s22 = scalar_lea.vmem %s53_s1, 512  ;;  %p1043_p8 = scmp.lt.s32.totalorder %s53_s1, %s53_s1 }
  0x4f   :  { %p1039_p7 = scmp.ne.s32.totalorder %s53_s1, %s1038_s22  ;;  %p1044_p9 = scmp.lt.s32.totalorder %s1038_s22, %s1038_s22 }
  0x51   :  { %p1045_p10 = por %p1044_p9, %p1043_p8 }
  0x53   :  { %p1046_p11 = pnand %p1045_p10, %p1039_p7 }
  0x55   :  { %1049 = shalt.err (!%p1046_p11)
}
  0x56   :  { %58 = dma.hbm_to_vmem [thread:$0]  %s1413_s3, 512, %s53_s1, [#allocation6], %s1151_s13, %s1151_s13, %s1152_s14  }
  0x57   :  { %s1157_s29 = smov [#allocation10]   ;;  %s1158_s15 = smov [#allocation13]  }
  0x58   :  { %s78_s30 = sshll.u32 %s1157_s29, 4  ;;  %s100_s16 = sshll.u32 %s1158_s15, 4  ;;  %s79_s30 = int_to_ptr.vmem [resolvable:$true] %s78_s30  ;;  %s101_s16 = int_to_ptr.vmem [resolvable:$true] %s100_s16 }
  0x59   :  { %s1050_s7 = scalar_lea.hbm %s1416_s6, 512 }
  0x5a   :  { %p1051_p12 = scmp.ne.s32.totalorder %s1416_s6, %s1050_s7  ;;  %p1054_p13 = scmp.lt.u32.totalorder %s1050_s7, %s1416_s6 }
  0x5c   :  { %p1056_p0 = pnand %p1054_p13, %p1051_p12 }
  0x5e   :  { %1059 = shalt.err (!%p1056_p0)
}
  0x5f   :  { %s1060_s3 = scalar_lea.vmem %s79_s30, 512  ;;  %p1065_p2 = scmp.lt.s32.totalorder %s79_s30, %s79_s30 }
  0x60   :  { %p1061_p1 = scmp.ne.s32.totalorder %s79_s30, %s1060_s3  ;;  %p1066_p3 = scmp.lt.s32.totalorder %s1060_s3, %s1060_s3 }
  0x62   :  { %p1067_p4 = por %p1066_p3, %p1065_p2 }
  0x64   :  { %p1068_p5 = pnand %p1067_p4, %p1061_p1 }
  0x66   :  { %1071 = shalt.err (!%p1068_p5)
}
  0x67   :  { %84 = dma.hbm_to_vmem [thread:$0]  %s1416_s6, 512, %s79_s30, [#allocation9], %s1151_s13, %s1151_s13, %s1152_s14  }
  0x68   :  { %s1072_s26 = scalar_lea.hbm %s1418_s8, 512 }
  0x69   :  { %p1073_p6 = scmp.ne.s32.totalorder %s1418_s8, %s1072_s26  ;;  %p1076_p7 = scmp.lt.u32.totalorder %s1072_s26, %s1418_s8 }
  0x6b   :  { %p1078_p8 = pnand %p1076_p7, %p1073_p6 }
  0x6d   :  { %1081 = shalt.err (!%p1078_p8)
}
  0x6e   :  { %s1082_s29 = scalar_lea.vmem %s101_s16, 512  ;;  %p1087_p10 = scmp.lt.s32.totalorder %s101_s16, %s101_s16 }
  0x6f   :  { %p1083_p9 = scmp.ne.s32.totalorder %s101_s16, %s1082_s29  ;;  %p1088_p11 = scmp.lt.s32.totalorder %s1082_s29, %s1082_s29 }
  0x71   :  { %p1089_p12 = por %p1088_p11, %p1087_p10 }
  0x73   :  { %p1090_p13 = pnand %p1089_p12, %p1083_p9 }
  0x75   :  { %1093 = shalt.err (!%p1090_p13)
}
  0x76   :  { %106 = dma.hbm_to_vmem [thread:$0]  %s1418_s8, 512, %s101_s16, [#allocation12], %s1151_s13, %s1151_s13, %s1152_s14  }
  0x77   :  { %s1159_s15 = smov [#allocation14]   ;;  %s1094_s20 = scalar_lea.hbm %s1420_s10, 1024 }
  0x78   :  { %s114_s17 = sshll.u32 %s1159_s15, 4  ;;  %p1095_p0 = scmp.ne.s32.totalorder %s1420_s10, %s1094_s20  ;;  %s115_s17 = int_to_ptr.vmem [resolvable:$true] %s114_s17 }
  0x79   :  { %p1098_p1 = scmp.lt.u32.totalorder %s1094_s20, %s1420_s10 }
  0x7b   :  { %p1100_p2 = pnand %p1098_p1, %p1095_p0 }
  0x7d   :  { %1103 = shalt.err (!%p1100_p2)
}
  0x7e   :  { %s1104_s1 = scalar_lea.vmem %s115_s17, 1024  ;;  %p1109_p4 = scmp.lt.s32.totalorder %s115_s17, %s115_s17 }
  0x7f   :  { %p1105_p3 = scmp.ne.s32.totalorder %s115_s17, %s1104_s1  ;;  %p1110_p5 = scmp.lt.s32.totalorder %s1104_s1, %s1104_s1 }
  0x81   :  { %p1111_p6 = por %p1110_p5, %p1109_p4 }
  0x83   :  { %p1112_p7 = pnand %p1111_p6, %p1105_p3 }
  0x85   :  { %1115 = shalt.err (!%p1112_p7)
}
  0x86   :  { %120 = dma.hbm_to_vmem [thread:$0]  %s1420_s10, 1024, %s115_s17, [#allocation15], %s1151_s13, %s1151_s13, %s1152_s14  }
  0x87   :  { %1138 = dma.done.wait [#allocation3], 128  }
  0x88   :  { %1139 = vsyncadd [#allocation3], 4294967168 }
  0x89   :  { %1140 = dma.done.wait [#allocation6], 768  }
  0x8a   :  { %1141 = vsyncadd [#allocation6], 4294966528 }
  0x8b   :  { %1142 = dma.done.wait [#allocation9], 1024  }
  0x8c   :  { %1143 = vsyncadd [#allocation9], 4294966272 }
  0x8d   :  { %1144 = dma.done.wait [#allocation12], 528  }
  0x8e   :  { %1145 = vsyncadd [#allocation12], 4294966768 }
  0x8f   :  { %1146 = dma.done.wait [#allocation15], 1024  }
  0x90   :  { %1147 = vsyncadd [#allocation15], 4294966272  ;;  %v1160_v0 = vmov 0.0|0.0   ;;  %vm1161_vm0 = vmmov 0   ;;  %v1162_v1 = vmov 0.0   ;;  %v148_v2 = vld [vmem:[#allocation5] sm:$0xff] }
  0x91   :  { %879 = vmatprep.subr.bf16.mxu1 %v1160_v0  ;;  %802 = vmatprep.mubr.msk.f32.mxu1 %vm1161_vm0, %v1162_v1  ;;  %v149_v3 = vld [vmem:[#allocation5 + $0x8] sm:$0xff]  ;;  %v147_v5 = vld [vmem:[#allocation2] sm:$0xff]  ;;  %vm157_vm1 = vcmask 130048   ;;  %v236_v6 = vld [vmem:[#allocation7] sm:$0xff]  ;;  %vm247_vm2 = vcmask 261120   ;;  %vm646_vm3 = vcmask 523264  }
  0x92   :  { %888 = vmatprep.subr.bf16.mxu0 %v1160_v0  ;;  %824 = vmatprep.mubr.msk.f32.mxu0 %vm1161_vm0, %v1162_v1  ;;  %v880_v4 = vpack.c.bf16 %v149_v3, %v148_v2  ;;  %v237_v7 = vld [vmem:[#allocation7 + $0x8] sm:$0xff]  ;;  %v238_v9 = vld [vmem:[#allocation7 + $0x10] sm:$0xff]  ;;  %v239_v10 = vld [vmem:[#allocation7 + $0x18] sm:$0xff]  ;;  %s1163_s29 = smov [#allocation16]  }
  0x93   :  { %v883_v8 = vpack.c.bf16 %v237_v7, %v236_v6  ;;  %v886_v11 = vpack.c.bf16 %v239_v10, %v238_v9  ;;  %v750_v12 = vld [vmem:[%s1412_s2] ss:$0 sm:$0xff]  ;;  %v326_v19 = vld [vmem:[#allocation8] sm:$0xff]  ;;  %v328_v24 = vld [vmem:[#allocation8 + $0x10] sm:$0xff]  ;;  %s737_s6 = sshll.u32 %s1163_s29, 4  ;;  %s738_s6 = int_to_ptr.vmem [resolvable:$true] %s737_s6 }
  0x94   :  { %881 = vmatpush3.bf16.msra.mxu1 %v880_v4  ;;  %v327_v20 = vld [vmem:[#allocation8 + $0x8] sm:$0xff]  ;;  %v329_v25 = vld [vmem:[#allocation8 + $0x18] sm:$0xff]  ;;  %v330_v33 = vld [vmem:[#allocation10] sm:$0xff]  ;;  %s1116_s30 = scalar_lea.vmem %s738_s6, 128  ;;  %p1121_p9 = scmp.lt.s32.totalorder %s738_s6, %s738_s6 }
  0x95   :  { %882 = vmatprep.subr.bf16.mxu1 %v1160_v0  ;;  %v895_v22 = vpack.c.bf16 %v327_v20, %v326_v19  ;;  %v898_v26 = vpack.c.bf16 %v329_v25, %v328_v24  ;;  %v490_v27 = vld [vmem:[#allocation13] sm:$0xff]  ;;  %v491_v28 = vld [vmem:[#allocation13 + $0x8] sm:$0xff]  ;;  %v492_v30 = vld [vmem:[#allocation13 + $0x10] sm:$0xff]  ;;  %p1117_p8 = scmp.ne.s32.totalorder %s738_s6, %s1116_s30  ;;  %p1122_p10 = scmp.lt.s32.totalorder %s1116_s30, %s1116_s30 }
  0x96   :  { %v907_v29 = vpack.c.bf16 %v491_v28, %v490_v27  ;;  %v493_v31 = vld [vmem:[#allocation13 + $0x18] sm:$0xff]  ;;  %v331_v34 = vld [vmem:[#allocation10 + $0x8] sm:$0xff]  ;;  %v332_v36 = vld [vmem:[#allocation10 + $0x10] sm:$0xff] }
  0x97   :  { %803 = vmatmul.mubr.msk.f32.vlgmr.msra.gmra.mrb[0].mxu1 %vm157_vm1, %v147_v5  ;;  %v910_v32 = vpack.c.bf16 %v493_v31, %v492_v30  ;;  %v889_v35 = vpack.c.bf16 %v331_v34, %v330_v33  ;;  %v333_v37 = vld [vmem:[#allocation10 + $0x18] sm:$0xff]  ;;  %v752_v39 = vld [vmem:[%s1414_s4] ss:$0 sm:$0xff]  ;;  %v495_v47 = vld [vmem:[%s1419_s9 + $0x8] sm:$0xff]  ;;  %p1123_p11 = por %p1122_p10, %p1121_p9 }
  0x98   :  { %813 = vmatprep.mubr.msk.f32.mxu1 %vm1161_vm0, %v1162_v1  ;;  %884 = vmatpush3.bf16.msra.mxu1 %v883_v8  ;;  %v892_v38 = vpack.c.bf16 %v333_v37, %v332_v36  ;;  %v494_v46 = vld [vmem:[%s1419_s9] sm:$0xff]  ;;  %v496_v53 = vld [vmem:[%s1419_s9 + $0x10] sm:$0xff]  ;;  %v497_v54 = vld [vmem:[%s1419_s9 + $0x18] sm:$0xff] }
  0x99   :  { %885 = vmatprep.subr.bf16.mxu1 %v1160_v0  ;;  %890 = vmatpush3.bf16.msra.mxu0 %v889_v35  ;;  %v901_v51 = vpack.c.bf16 %v495_v47, %v494_v46  ;;  %v904_v55 = vpack.c.bf16 %v497_v54, %v496_v53  ;;  %v638_v58 = vld [vmem:[#allocation14] sm:$0xff]  ;;  %v639_v59 = vld [vmem:[#allocation14 + $0x8] sm:$0xff]  ;;  %v640_v61 = vld [vmem:[#allocation14 + $0x10] sm:$0xff]  ;;  %p1124_p12 = pnand %p1123_p11, %p1117_p8 }
  0x9a   :  { %891 = vmatprep.subr.bf16.mxu0 %v1160_v0  ;;  %v913_v60 = vpack.c.bf16 %v639_v59, %v638_v58  ;;  %v641_v62 = vld [vmem:[#allocation14 + $0x18] sm:$0xff]  ;;  %v642_v2 = vld [vmem:[#allocation14 + $0x20] sm:$0xff]  ;;  %v643_v3 = vld [vmem:[#allocation14 + $0x28] sm:$0xff] }
  0x9b   :  { %v916_v63 = vpack.c.bf16 %v641_v62, %v640_v61  ;;  %v919_v4 = vpack.c.bf16 %v643_v3, %v642_v2  ;;  %v644_v5 = vld [vmem:[#allocation14 + $0x30] sm:$0xff]  ;;  %v756_v8 = vld [vmem:[#allocation11] ss:$0 sm:$0xff]  ;;  %v760_v20 = vld [vmem:[%s1421_s11] ss:$0 sm:$0xff] }
  0x9c   :  { %887 = vmatpush3.bf16.msra.mxu1 %v886_v11 }
  0x9d   :  { %894 = vmatprep.subr.bf16.mxu1 %v1160_v0  ;;  %893 = vmatpush3.bf16.msra.mxu0 %v892_v38 }
  0x9e   :  { %900 = vmatprep.subr.bf16.mxu0 %v1160_v0 }
 0x16a   :  { %v227_v13 = vpop.f32.mrb[0].mxu1 }
 0x16b   :  { %v228_v14 = vadd.f32 %v750_v12, %v227_v13  ;;  %v804_v15 = vpop.f32.mrb[1].mxu1 }
 0x16d   :  { %v231_v16 = vadd.f32 3.0, %v228_v14 }
 0x16f   :  { %v232_v17 = vmax.f32 %v231_v16, 0.0 }
 0x171   :  { %v233_v18 = vmin.f32 %v232_v17, 6.0 }
 0x173   :  { %v234_v21 = vmul.f32 0.16666667, %v233_v18 }
 0x175   :  { %v235_v23 = vmul.f32 %v234_v21, %v228_v14 }
 0x177   :  { %814 = vmatmul.mubr.msk.f32.vlgmr.msra.gmra.mrb[2].mxu1 %vm247_vm2, %v235_v23 }
 0x178   :  { %896 = vmatpush3.bf16.msra.mxu1 %v895_v22  ;;  %835 = vmatprep.mubr.msk.f32.mxu1 %vm1161_vm0, %v1162_v1 }
 0x179   :  { %897 = vmatprep.subr.bf16.mxu1 %v1160_v0 }
 0x17c   :  { %899 = vmatpush3.bf16.msra.mxu1 %v898_v26 }
 0x17d   :  { %906 = vmatprep.subr.bf16.mxu1 %v1160_v0 }
 0x17f   :  { %836 = vmatmul.mubr.msk.f32.vlgmr.msra.gmra.mrb[4].mxu1 %vm247_vm2, %v235_v23 }
 0x180   :  { %908 = vmatpush3.bf16.msra.mxu1 %v907_v29  ;;  %857 = vmatprep.mubr.msk.f32.mxu1 %vm1161_vm0, %v1162_v1 }
 0x181   :  { %909 = vmatprep.subr.bf16.mxu1 %v1160_v0 }
 0x184   :  { %911 = vmatpush3.bf16.msra.mxu1 %v910_v32 }
 0x187   :  { %858 = vmatmul.mubr.msk.f32.vlgmr.msra.gmra.mrb[6].mxu1 %vm247_vm2, %v235_v23 }
 0x24a   :  { %v317_v40 = vpop.f32.mrb[2].mxu1 }
 0x24b   :  { %v318_v41 = vadd.f32 %v752_v39, %v317_v40  ;;  %v815_v42 = vpop.f32.mrb[3].mxu1 }
 0x24d   :  { %v321_v43 = vadd.f32 3.0, %v318_v41 }
 0x24f   :  { %v322_v44 = vmax.f32 %v321_v43, 0.0 }
 0x251   :  { %v323_v45 = vmin.f32 %v322_v44, 6.0 }
 0x252   :  { %v473_v48 = vpop.f32.mrb[4].mxu1 }
 0x253   :  { %v324_v49 = vmul.f32 0.16666667, %v323_v45  ;;  %v837_v50 = vpop.f32.mrb[5].mxu1 }
 0x255   :  { %v325_v52 = vmul.f32 %v324_v49, %v318_v41 }
 0x257   :  { %825 = vmatmul.mubr.msk.f32.vlgmr.msra.gmra.mrb[0].mxu0 %vm247_vm2, %v325_v52 }
 0x258   :  { %902 = vmatpush3.bf16.msra.mxu0 %v901_v51  ;;  %846 = vmatprep.mubr.msk.f32.mxu0 %vm1161_vm0, %v1162_v1 }
 0x259   :  { %903 = vmatprep.subr.bf16.mxu0 %v1160_v0 }
 0x25a   :  { %v634_v56 = vpop.f32.mrb[6].mxu1 }
 0x25b   :  { %v859_v57 = vpop.f32.mrb[7].mxu1 }
 0x25c   :  { %905 = vmatpush3.bf16.msra.mxu0 %v904_v55 }
 0x25d   :  { %912 = vmatprep.subr.bf16.mxu0 %v1160_v0 }
 0x25f   :  { %847 = vmatmul.mubr.msk.f32.vlgmr.msra.gmra.mrb[2].mxu0 %vm247_vm2, %v325_v52 }
 0x260   :  { %876 = vmatprep.mubr.msk.f32.mxu0 %vm1161_vm0, %v1162_v1  ;;  %914 = vmatpush3.bf16.msra.mxu0 %v913_v60  ;;  %v645_v1 = vld [vmem:[#allocation14 + $0x38] sm:$0xff] }
 0x261   :  { %915 = vmatprep.subr.bf16.mxu0 %v1160_v0  ;;  %v922_v6 = vpack.c.bf16 %v645_v1, %v644_v5 }
 0x264   :  { %917 = vmatpush3.bf16.msra.mxu0 %v916_v63 }
 0x265   :  { %918 = vmatprep.subr.bf16.mxu0 %v1160_v0 }
 0x268   :  { %920 = vmatpush3.bf16.msra.mxu0 %v919_v4 }
 0x269   :  { %921 = vmatprep.subr.bf16.mxu0 %v1160_v0 }
 0x26c   :  { %923 = vmatpush3.bf16.msra.mxu0 %v922_v6 }
 0x32a   :  { %v403_v7 = vpop.f32.mrb[0].mxu0 }
 0x32b   :  { %v474_v9 = vadd.f32 %v473_v48, %v403_v7  ;;  %v826_v10 = vpop.f32.mrb[1].mxu0 }
 0x32d   :  { %v484_v11 = vadd.f32 %v756_v8, %v474_v9 }
 0x32f   :  { %v485_v12 = vadd.f32 3.0, %v484_v11 }
 0x331   :  { %v486_v13 = vmax.f32 %v485_v12, 0.0 }
 0x332   :  { %v564_v14 = vpop.f32.mrb[2].mxu0 }
 0x333   :  { %v487_v15 = vmin.f32 %v486_v13, 6.0  ;;  %v635_v16 = vadd.f32 %v634_v56, %v564_v14  ;;  %v848_v17 = vpop.f32.mrb[3].mxu0 }
 0x335   :  { %v488_v18 = vmul.f32 0.16666667, %v487_v15 }
 0x337   :  { %v489_v19 = vmul.f32 %v488_v18, %v484_v11 }
 0x339   :  { %877 = vmatmul.mubr.msk.f32.vlgmr.msra.gmra.mrb[4].mxu0 %vm646_vm3, %v489_v19 }
 0x40c   :  { %v716_v0 = vpop.f32.mrb[4].mxu0 }
 0x40d   :  { %v720_v21 = vadd.f32 %v716_v0, %v635_v16  ;;  %v878_v22 = vpop.f32.mrb[5].mxu0 }
 0x40f   :  { %v728_v23 = vadd.f32 %v760_v20, %v720_v21 }
 0x411   :  { %938 = vtanh.f32 %v728_v23 }
 0x41b   :  { %v939_v24 = vpop.eup %938 }
 0x41c   :  { %730 = vst [vmem:[#allocation16] sm:$0xff] %v939_v24 }
 0x41d   :  { %1127 = shalt.err (!%p1124_p12)
}
 0x41e   :  { %s1128_s11 = scalar_lea.hbm %s1422_s12, 128 }
 0x41f   :  { %p1129_p13 = scmp.ne.s32.totalorder %s1422_s12, %s1128_s11  ;;  %p1132_p0 = scmp.lt.u32.totalorder %s1128_s11, %s1422_s12 }
 0x421   :  { %p1134_p1 = pnand %p1132_p0, %p1129_p13 }
 0x423   :  { %1137 = shalt.err (!%p1134_p1)
}
 0x424   :  { %740 = dma.vmem_to_hbm [thread:$0]  %s738_s6, 128, %s1422_s12, [#allocation4]  }
 0x425   :  { %1148 = dma.done.wait [#allocation4], 128  }
 0x426   :  { %1149 = vsyncadd [#allocation4], 4294967168 }
 0x427   :  { %744 = vsyncpa [#allocation3], 1 }
 0x428   :  { %745 = vsyncpa [#allocation6], 1 }
 0x429   :  { %746 = vsyncpa [#allocation9], 1 }
 0x42a   :  { %747 = vsyncpa [#allocation12], 1 }
 0x42b   :  { %748 = vsyncpa [#allocation15], 1 }
 0x42c   :  { %749 = vsyncpa [#allocation4], 1 }

</bundles_post_ra>
